<compile_context>
chip_gen: v7x
topology: tpu7x:2x2x1
jax: 0.10.0
libtpu: 0.0.40
codegen_flags: <defaults>
</compile_context>

<pallas_src>
import jax
import jax.numpy as jnp
from jax import lax
from jax.experimental import pallas as pl
from jax.experimental.pallas import tpu as pltpu


def _round_up(x, m):
    return ((x + m - 1) // m) * m


def _num_tensorcores():
    # Best-effort; if the attribute is missing we assume 1 (safe, same as before).
    try:
        dev = jax.local_devices()[0]
        return max(1, int(getattr(dev, "num_cores", 1) or 1))
    except Exception:
        return 1


def _vmem_budget_bytes():
    # ~96 MiB on v5e/v6e (128 MiB physical), ~48 MiB on v7x (64 MiB physical).
    try:
        cap = int(pltpu.get_tpu_info().vmem_capacity_bytes)
    except Exception:
        cap = 64 * 1024 * 1024
    return (cap * 3) // 4


def _vmem_limit(est, budget):
    return int(min(max(est * 5 // 4, 32 * 1024 * 1024), budget))


# ----------------------------------------------------------------------------------
# Fused single-pass kernel: logits stripe stays VMEM-resident, finalize in place.
# ----------------------------------------------------------------------------------
def _fused_kernel(x_ref, w_ref, b_ref, o_ref, m_sc, l_sc):
    j = pl.program_id(1)

    @pl.when(j == 0)
    def _():
        m_sc[...] = jnp.full_like(m_sc, -jnp.inf)
        l_sc[...] = jnp.zeros_like(l_sc)

    # bf16 operands on the MXU, f32 accumulation; weight used as (tn, d_model).
    chunk = lax.dot_general(
        x_ref[...], w_ref[...],
        dimension_numbers=(((1,), (1,)), ((), ())),
        preferred_element_type=jnp.float32,
    ) + b_ref[...]                                       # (tm, tn) f32

    # Online logsumexp across vocab chunks (only (tm, 1) state).
    m_prev = m_sc[...]
    m_new = jnp.maximum(m_prev, jnp.max(chunk, axis=-1, keepdims=True))
    l_sc[...] = l_sc[...] * jnp.exp(m_prev - m_new) + jnp.sum(
        jnp.exp(chunk - m_new), axis=-1, keepdims=True)
    m_sc[...] = m_new

    # Stash raw logits into the VMEM-resident output stripe (no HBM round trip).
    tn = chunk.shape[1]
    col = pl.multiple_of(j * tn, 128)
    o_ref[:, pl.ds(col, tn)] = chunk.astype(o_ref.dtype)

    @pl.when(j == pl.num_programs(1) - 1)
    def _():
        lse = m_sc[...] + jnp.log(l_sc[...])
        o_ref[...] = (o_ref[...].astype(jnp.float32) - lse).astype(o_ref.dtype)


# ----------------------------------------------------------------------------------
# Two-pass fallback (bf16 intermediate) for when the vocab stripe does not fit VMEM.
# ----------------------------------------------------------------------------------
def _logits_lse_kernel(x_ref, w_ref, b_ref, logits_ref, lse_ref, m_sc, l_sc):
    j = pl.program_id(1)

    @pl.when(j == 0)
    def _():
        m_sc[...] = jnp.full_like(m_sc, -jnp.inf)
        l_sc[...] = jnp.zeros_like(l_sc)

    chunk = lax.dot_general(
        x_ref[...], w_ref[...],
        dimension_numbers=(((1,), (1,)), ((), ())),
        preferred_element_type=jnp.float32,
    ) + b_ref[...]

    logits_ref[...] = chunk.astype(logits_ref.dtype)     # bf16 intermediate

    m_prev = m_sc[...]
    m_new = jnp.maximum(m_prev, jnp.max(chunk, axis=-1, keepdims=True))
    l_sc[...] = l_sc[...] * jnp.exp(m_prev - m_new) + jnp.sum(
        jnp.exp(chunk - m_new), axis=-1, keepdims=True)
    m_sc[...] = m_new

    @pl.when(j == pl.num_programs(1) - 1)
    def _():
        lse_ref[...] = m_sc[...] + jnp.log(l_sc[...])


def _finalize_kernel(logits_ref, lse_ref, o_ref):
    # log_softmax = logits - logsumexp, done in f32, stored in the output dtype.
    o_ref[...] = (logits_ref[...].astype(jnp.float32) - lse_ref[...]).astype(o_ref.dtype)


# ----------------------------------------------------------------------------------
# Wrapper
# ----------------------------------------------------------------------------------
def generator_forward(x, weight, bias, *, tile_m=1024, tile_n=512):
    """log_softmax(x @ weight.T + bias, axis=-1).

    x: (..., d_model); weight: (vocab, d_model); bias: (vocab,).
    """
    d_model = x.shape[-1]
    vocab = weight.shape[0]
    lead_shape = x.shape[:-1]
    rows = 1
    for s in lead_shape:
        rows *= s

    out_dtype = x.dtype
    out_itemsize = x.dtype.itemsize

    # ---- vocab tiling: pad vocab up to a multiple of the tile (>=128, <=tile_n) ----
    tn = max(128, min((tile_n // 128) * 128, _round_up(vocab, 128)))
    vocab_p = _round_up(vocab, tn)
    n_vt = vocab_p // tn

    # ---- generation-aware VMEM budget ----
    budget = _vmem_budget_bytes()

    rows8 = _round_up(rows, 8)
    max_tm = min(_round_up(tile_m, 8), rows8)
    w_stream = vocab_p * d_model * 2                      # one bf16 weight sweep

    def fused_vmem(tm):
        return (2 * tm * d_model * 2                      # x tile (bf16, 2-buffered)
                + 2 * tn * d_model * 2                    # weight chunk (bf16, 2-buffered)
                + 2 * 8 * tn * 4                          # bias chunk
                + 2 * tm * vocab_p * out_itemsize         # resident output stripe
                + 2 * tm * tn * 4                         # f32 chunk temporaries
                + 4 * tm * 4)                             # running max / sum-exp

    def twopass_vmem(tm):
        return (2 * tm * d_model * 2
                + 2 * tn * d_model * 2
                + 2 * 8 * tn * 4
                + 2 * tm * tn * 2                         # bf16 logits tile
                + 2 * tm * 4                              # lse tile
                + 2 * tm * tn * 4                         # f32 chunk temporaries
                + 4 * tm * 4)

    cands = [c for c in (1024, 768, 512, 384, 256, 192, 128, 96, 64, 48, 32, 24, 16, 8)
             if c <= max_tm]
    if not cands:
        cands = [8]
    tm_fused = next((c for c in cands if fused_vmem(c) <= budget), None)
    tm_two = next((c for c in cands if twopass_vmem(c) <= budget), cands[-1])

    def hbm_traffic(tm, fused):
        n_rt = (rows + tm - 1) // tm
        t = n_rt * w_stream                               # weight re-stream / row tile
        t += n_rt * tm * d_model * 2                      # x stream (bf16)
        t += n_rt * tm * vocab_p * out_itemsize           # final output write
        if not fused:
            t += 2 * n_rt * tm * vocab_p * 2              # bf16 intermediate write + read
        return t

    use_fused = (tm_fused is not None
                 and hbm_traffic(tm_fused, True) <= hbm_traffic(tm_two, False))
    tm = tm_fused if use_fused else tm_two

    # ---- keep both TensorCores busy on multi-core parts (v7x): >=2 row tiles ----
    n_tc = _num_tensorcores()
    if n_tc >= 2 and rows8 >= 16 and (_round_up(rows, tm) // tm) < 2:
        tm = max(8, _round_up((rows8 + n_tc - 1) // n_tc, 8))

    rows_p = _round_up(rows, tm)
    n_rt = rows_p // tm

    # ---- operands: pre-cast once, pad rows / vocab ----
    x2 = x.reshape(rows, d_model).astype(jnp.bfloat16)
    if rows_p != rows:
        x2 = jnp.pad(x2, ((0, rows_p - rows), (0, 0)))
    w_lp = weight.astype(jnp.bfloat16)
    b_f32 = bias.astype(jnp.float32)
    if vocab_p != vocab:
        w_lp = jnp.pad(w_lp, ((0, vocab_p - vocab), (0, 0)))
        # Mask padded vocab columns with a huge negative bias so they never affect
        # the online logsumexp (and get sliced off at the end).
        b_f32 = jnp.pad(b_f32, (0, vocab_p - vocab), constant_values=-1e30)
    b2 = b_f32.reshape(1, vocab_p)

    if use_fused:
        vmem_limit = _vmem_limit(fused_vmem(tm), budget)
        # NOTE: on v7x, pipeline_mode=pl.Buffered(3) on the weight spec could hide
        # residual DMA; left at the default double-buffering here.
        out_p = pl.pallas_call(
            _fused_kernel,
            out_shape=jax.ShapeDtypeStruct((rows_p, vocab_p), out_dtype),
            grid_spec=pltpu.PrefetchScalarGridSpec(
                num_scalar_prefetch=0,
                grid=(n_rt, n_vt),
                in_specs=[
                    pl.BlockSpec((tm, d_model), lambda i, j: (i, 0)),
                    pl.BlockSpec((tn, d_model), lambda i, j: (j, 0)),
                    pl.BlockSpec((1, tn), lambda i, j: (0, j)),
                ],
                out_specs=pl.BlockSpec((tm, vocab_p), lambda i, j: (i, 0)),
                scratch_shapes=[
                    pltpu.VMEM((tm, 1), jnp.float32),     # running max
                    pltpu.VMEM((tm, 1), jnp.float32),     # running sum-exp
                ],
            ),
            compiler_params=pltpu.CompilerParams(
                dimension_semantics=("parallel", "arbitrary"),
                vmem_limit_bytes=vmem_limit,
            ),
        )(x2, w_lp, b2)
    else:
        # ---- pass-2 tile: widest lane-dense block (multiple of tn) that fits ----
        tn2 = tn
        p2_est = 2 * tm * tn * (2 + out_itemsize) + tm * tn * 4 + 2 * tm * 4
        for k in range(n_vt, 0, -1):
            if n_vt % k:
                continue
            cand = k * tn
            est_k = 2 * tm * cand * (2 + out_itemsize) + tm * cand * 4 + 2 * tm * 4
            if est_k <= budget:
                tn2, p2_est = cand, est_k
                break
        vmem_limit = _vmem_limit(max(twopass_vmem(tm), p2_est), budget)

        # Pass 1: bf16 logits + per-row logsumexp (vocab = reduction axis, last).
        logits, lse = pl.pallas_call(
            _logits_lse_kernel,
            out_shape=(
                jax.ShapeDtypeStruct((rows_p, vocab_p), jnp.bfloat16),
                jax.ShapeDtypeStruct((rows_p, 1), jnp.float32),
            ),
            grid_spec=pltpu.PrefetchScalarGridSpec(
                num_scalar_prefetch=0,
                grid=(n_rt, n_vt),
                in_specs=[
                    pl.BlockSpec((tm, d_model), lambda i, j: (i, 0)),
                    pl.BlockSpec((tn, d_model), lambda i, j: (j, 0)),
                    pl.BlockSpec((1, tn), lambda i, j: (0, j)),
                ],
                out_specs=[
                    pl.BlockSpec((tm, tn), lambda i, j: (i, j)),
                    pl.BlockSpec((tm, 1), lambda i, j: (i, 0)),
                ],
                scratch_shapes=[
                    pltpu.VMEM((tm, 1), jnp.float32),
                    pltpu.VMEM((tm, 1), jnp.float32),
                ],
            ),
            compiler_params=pltpu.CompilerParams(
                dimension_semantics=("parallel", "arbitrary"),
                vmem_limit_bytes=vmem_limit,
            ),
        )(x2, w_lp, b2)

        # Pass 2: subtract the per-row logsumexp (pure elementwise, HBM-bound).
        out_p = pl.pallas_call(
            _finalize_kernel,
            out_shape=jax.ShapeDtypeStruct((rows_p, vocab_p), out_dtype),
            grid_spec=pltpu.PrefetchScalarGridSpec(
                num_scalar_prefetch=0,
                grid=(n_rt, vocab_p // tn2),
                in_specs=[
                    pl.BlockSpec((tm, tn2), lambda i, j: (i, j)),
                    pl.BlockSpec((tm, 1), lambda i, j: (i, 0)),
                ],
                out_specs=pl.BlockSpec((tm, tn2), lambda i, j: (i, j)),
            ),
            compiler_params=pltpu.CompilerParams(
                dimension_semantics=("parallel", "parallel"),
                vmem_limit_bytes=vmem_limit,
            ),
        )(logits, lse)

    out = out_p[:rows, :vocab]
    return out.reshape(*lead_shape, vocab)


if __name__ == "__main__":
    # Small shapes implied by the module: tokens with d_model features -> vocab logits.
    batch, seq, d_model, vocab = 2, 8, 32, 128

    key = jax.random.PRNGKey(0)
    kx, kw, kb = jax.random.split(key, 3)

    x = jax.random.normal(kx, (batch, seq, d_model), dtype=jnp.float32)
    # nn.Linear(d_model, vocab): W (vocab, d_model), b (vocab,)
    weight = jax.random.normal(kw, (vocab, d_model), dtype=jnp.float32) * 0.05
    bias = jax.random.normal(kb, (vocab,), dtype=jnp.float32) * 0.01

    out = generator_forward(x, weight, bias)
    out = jax.block_until_ready(out)

    # Sanity check vs. plain JAX reference (tolerance loosened for bf16 MXU operands).
    ref = jax.nn.log_softmax(x @ weight.T + bias, axis=-1)
    assert out.shape == (batch, seq, vocab)
    max_err = float(jnp.max(jnp.abs(out - ref)))
    assert max_err < 2e-2, f"max abs err {max_err}"

    print("KERNEL_OK")
</pallas_src>

<mosaic_0001>
module attributes {stable_mosaic.version = 11 : i64} {
  func.func @_fused_kernel(%arg0: i32, %arg1: i32, %arg2: memref<16x32xbf16, #tpu.memory_space<vmem>>, %arg3: memref<128x32xbf16, #tpu.memory_space<vmem>>, %arg4: memref<1x128xf32, #tpu.memory_space<vmem>>, %arg5: memref<16x128xf32, #tpu.memory_space<vmem>>, %arg6: memref<16x1xf32, #tpu.memory_space<vmem>>, %arg7: memref<16x1xf32, #tpu.memory_space<vmem>>) attributes {dimension_semantics = [#tpu.dimension_semantics<parallel>, #tpu.dimension_semantics<arbitrary>], iteration_bounds = array<i64: 1, 1>, scalar_prefetch = 0 : i64, scratch_operands = 2 : i64, tpu.core_type = #tpu.core_type<tc>, window_params = [{transform_indices = @transform_0, window_bounds = array<i64: 16, 32>}, {transform_indices = @transform_1, window_bounds = array<i64: 128, 32>}, {transform_indices = @transform_2, window_bounds = array<i64: 1, 128>}, {transform_indices = @transform_3, window_bounds = array<i64: 16, 128>}]} {
    %c0_i32 = arith.constant 0 : i32
    %0 = arith.cmpi eq, %arg1, %c0_i32 : i32
    %1 = arith.extui %0 : i1 to i32
    %c0_i32_0 = arith.constant 0 : i32
    %2 = arith.cmpi ne, %1, %c0_i32_0 : i32
    scf.if %2 {
      %cst_19 = arith.constant 0xFF800000 : f32
      %32 = vector.broadcast %cst_19 : f32 to vector<16x1xf32>
      %c0_20 = arith.constant 0 : index
      %c0_21 = arith.constant 0 : index
      %33 = vector.load %arg6[%c0_20, %c0_21] : memref<16x1xf32, #tpu.memory_space<vmem>>, vector<16x1xf32>
      tpu.vector_store %arg6[%c0_20, %c0_21], %32 {strides = array<i32>} : memref<16x1xf32, #tpu.memory_space<vmem>>, vector<16x1xf32>,
      %cst_22 = arith.constant 0.000000e+00 : f32
      %34 = vector.broadcast %cst_22 : f32 to vector<16x1xf32>
      %c0_23 = arith.constant 0 : index
      %c0_24 = arith.constant 0 : index
      %35 = vector.load %arg7[%c0_23, %c0_24] : memref<16x1xf32, #tpu.memory_space<vmem>>, vector<16x1xf32>
      tpu.vector_store %arg7[%c0_23, %c0_24], %34 {strides = array<i32>} : memref<16x1xf32, #tpu.memory_space<vmem>>, vector<16x1xf32>,
    } else {
    }
    %c0 = arith.constant 0 : index
    %c0_1 = arith.constant 0 : index
    %3 = vector.load %arg2[%c0, %c0_1] : memref<16x32xbf16, #tpu.memory_space<vmem>>, vector<16x32xbf16>
    %c0_2 = arith.constant 0 : index
    %c0_3 = arith.constant 0 : index
    %4 = vector.load %arg3[%c0_2, %c0_3] : memref<128x32xbf16, #tpu.memory_space<vmem>>, vector<128x32xbf16>
    %cst = arith.constant dense<0.000000e+00> : vector<16x128xf32>
    %5 = tpu.matmul %3, %4, %cst {dimension_numbers = #tpu.dot_dimension_numbers<[1], [1], [0], [0], [0, 0, 1, 0], [], []>} : vector<16x32xbf16>, vector<128x32xbf16>, vector<16x128xf32> -> vector<16x128xf32>
    %c0_4 = arith.constant 0 : index
    %c0_5 = arith.constant 0 : index
    %6 = vector.load %arg4[%c0_4, %c0_5] : memref<1x128xf32, #tpu.memory_space<vmem>>, vector<1x128xf32>
    %7 = vector.broadcast %6 : vector<1x128xf32> to vector<16x128xf32>
    %8 = arith.addf %5, %7 : vector<16x128xf32>
    %c0_6 = arith.constant 0 : index
    %c0_7 = arith.constant 0 : index
    %9 = vector.load %arg6[%c0_6, %c0_7] : memref<16x1xf32, #tpu.memory_space<vmem>>, vector<16x1xf32>
    %cst_8 = arith.constant dense<0xFF800000> : vector<16xf32>
    %10 = vector.multi_reduction <maximumf>, %8, %cst_8 [1] : vector<16x128xf32> to vector<16xf32>
    %11 = vector.shape_cast %10 : vector<16xf32> to vector<16x1xf32>
    %12 = arith.maximumf %9, %11 : vector<16x1xf32>
    %c0_9 = arith.constant 0 : index
    %c0_10 = arith.constant 0 : index
    %13 = vector.load %arg7[%c0_9, %c0_10] : memref<16x1xf32, #tpu.memory_space<vmem>>, vector<16x1xf32>
    %14 = arith.subf %9, %12 : vector<16x1xf32>
    %15 = math.exp %14 : vector<16x1xf32>
    %16 = arith.mulf %13, %15 : vector<16x1xf32>
    %17 = vector.broadcast %12 : vector<16x1xf32> to vector<16x128xf32>
    %18 = arith.subf %8, %17 : vector<16x128xf32>
    %19 = math.exp %18 : vector<16x128xf32>
    %cst_11 = arith.constant dense<0.000000e+00> : vector<16xf32>
    %20 = vector.multi_reduction <add>, %19, %cst_11 [1] : vector<16x128xf32> to vector<16xf32>
    %21 = vector.shape_cast %20 : vector<16xf32> to vector<16x1xf32>
    %22 = arith.addf %16, %21 : vector<16x1xf32>
    %c0_12 = arith.constant 0 : index
    %c0_13 = arith.constant 0 : index
    %23 = vector.load %arg7[%c0_12, %c0_13] : memref<16x1xf32, #tpu.memory_space<vmem>>, vector<16x1xf32>
    tpu.vector_store %arg7[%c0_12, %c0_13], %22 {strides = array<i32>} : memref<16x1xf32, #tpu.memory_space<vmem>>, vector<16x1xf32>,
    %c0_14 = arith.constant 0 : index
    %c0_15 = arith.constant 0 : index
    %24 = vector.load %arg6[%c0_14, %c0_15] : memref<16x1xf32, #tpu.memory_space<vmem>>, vector<16x1xf32>
    tpu.vector_store %arg6[%c0_14, %c0_15], %12 {strides = array<i32>} : memref<16x1xf32, #tpu.memory_space<vmem>>, vector<16x1xf32>,
    %c128_i32 = arith.constant 128 : i32
    %25 = arith.muli %arg1, %c128_i32 : i32
    %26 = tpu.assume_multiple %25, 128 : i32
    %c0_16 = arith.constant 0 : index
    %27 = arith.index_cast %26 : i32 to index
    %28 = vector.load %arg5[%c0_16, %27] : memref<16x128xf32, #tpu.memory_space<vmem>>, vector<16x128xf32>
    tpu.vector_store %arg5[%c0_16, %27], %8 {strides = array<i32>} : memref<16x128xf32, #tpu.memory_space<vmem>>, vector<16x128xf32>,
    %c0_i32_17 = arith.constant 0 : i32
    %29 = arith.cmpi eq, %arg1, %c0_i32_17 : i32
    %30 = arith.extui %29 : i1 to i32
    %c0_i32_18 = arith.constant 0 : i32
    %31 = arith.cmpi ne, %30, %c0_i32_18 : i32
    scf.if %31 {
      %c0_19 = arith.constant 0 : index
      %c0_20 = arith.constant 0 : index
      %32 = vector.load %arg6[%c0_19, %c0_20] : memref<16x1xf32, #tpu.memory_space<vmem>>, vector<16x1xf32>
      %c0_21 = arith.constant 0 : index
      %c0_22 = arith.constant 0 : index
      %33 = vector.load %arg7[%c0_21, %c0_22] : memref<16x1xf32, #tpu.memory_space<vmem>>, vector<16x1xf32>
      %34 = math.log %33 : vector<16x1xf32>
      %35 = arith.addf %32, %34 : vector<16x1xf32>
      %c0_23 = arith.constant 0 : index
      %c0_24 = arith.constant 0 : index
      %36 = vector.load %arg5[%c0_23, %c0_24] : memref<16x128xf32, #tpu.memory_space<vmem>>, vector<16x128xf32>
      %37 = vector.broadcast %35 : vector<16x1xf32> to vector<16x128xf32>
      %38 = arith.subf %36, %37 : vector<16x128xf32>
      %c0_25 = arith.constant 0 : index
      %c0_26 = arith.constant 0 : index
      %39 = vector.load %arg5[%c0_25, %c0_26] : memref<16x128xf32, #tpu.memory_space<vmem>>, vector<16x128xf32>
      tpu.vector_store %arg5[%c0_25, %c0_26], %38 {strides = array<i32>} : memref<16x128xf32, #tpu.memory_space<vmem>>, vector<16x128xf32>,
    } else {
    }
    return
  }
  func.func @transform_0(%arg0: i32, %arg1: i32) -> (i32, i32) {
    %c0_i32 = arith.constant 0 : i32
    %c0_i32_0 = arith.constant 0 : i32
    return %arg0, %c0_i32 : i32, i32
  }
  func.func @transform_1(%arg0: i32, %arg1: i32) -> (i32, i32) {
    %c0_i32 = arith.constant 0 : i32
    %c0_i32_0 = arith.constant 0 : i32
    return %arg1, %c0_i32 : i32, i32
  }
  func.func @transform_2(%arg0: i32, %arg1: i32) -> (i32, i32) {
    %c0_i32 = arith.constant 0 : i32
    %c0_i32_0 = arith.constant 0 : i32
    return %c0_i32, %arg1 : i32, i32
  }
  func.func @transform_3(%arg0: i32, %arg1: i32) -> (i32, i32) {
    %c0_i32 = arith.constant 0 : i32
    %c0_i32_0 = arith.constant 0 : i32
    return %arg0, %c0_i32 : i32, i32
  }
}

</mosaic_0001>

<bundles_post_ra>
// kernel: tpu_custom_call.1
= control target key start
LH: loop header
LB: loop body
LE: loop exit
PB: predicated region body
PF: predicated region fallthrough
CT: control target
= control target key end

     0   :  { %v355_v1 = vmov 0.0   ;;  %vm95_vm0 = vcmask 261120   ;;  %vm356_vm1 = vmmov 0   ;;  %s451_s0 = inlined_call_operand.vmem [shape: bf16[16,32], index: 0, kind: input, shape index: {}]   ;;  %s452_s1 = inlined_call_operand.vmem [shape: bf16[128,32], index: 1, kind: input, shape index: {}]   ;;  %s453_s2 = inlined_call_operand.vmem [shape: f32[1,128], index: 2, kind: input, shape index: {}]   ;;  %s454_s3 = inlined_call_operand.hbm [shape: f32[16,128], index: 3, kind: output, shape index: {}]  }
   0x1   :  { %v310_v0 = vld [vmem:[%s452_s1] sm:$0xff]   ;;  %281 = vmatprep.subr.bf16.mxu0 %v355_v1  ;;  %v311_v3 = vld [vmem:[%s452_s1 + $0x8] sm:$0xff]   ;;  %297 = vmatprep.mubr.msk.bf16.mxu0 %vm356_vm1, %v355_v1 }
   0x2   :  { %v100_v2 = vsel %vm95_vm0, %v310_v0, 0  ;;  %v103_v4 = vsel %vm95_vm0, %v311_v3, 0 }
   0x3   :  { %282 = vmatpush3.bf16.xpose.msra.mxu0 %v100_v2 }
   0x4   :  { %283 = vmatprep.subr.bf16.mxu0 %v355_v1 }
   0x5   :  { %8 = vsyncpa [#allocation5], 0  ;;  %v312_v5 = vld [vmem:[%s452_s1 + $0x10] sm:$0xff]   ;;  %v313_v7 = vld [vmem:[%s452_s1 + $0x18] sm:$0xff]   ;;  %vm20_vm2 = vcmask 7168   ;;  %v357_v25 = vmov -inf  }
   0x6   :  { %v106_v6 = vsel %vm95_vm0, %v312_v5, 0  ;;  %v109_v8 = vsel %vm95_vm0, %v313_v7, 0  ;;  %v314_v9 = vld [vmem:[%s452_s1 + $0x20] sm:$0xff]   ;;  %v315_v11 = vld [vmem:[%s452_s1 + $0x28] sm:$0xff]   ;;  %v316_v13 = vld [vmem:[%s452_s1 + $0x30] sm:$0xff]   ;;  %21 = vst.msk [vmem:[#allocation2] sm:$0xff] %vm20_vm2, %v357_v25 }
   0x7   :  { %v112_v10 = vsel %vm95_vm0, %v314_v9, 0  ;;  %v115_v12 = vsel %vm95_vm0, %v315_v11, 0  ;;  %v118_v14 = vsel %vm95_vm0, %v316_v13, 0  ;;  %v317_v15 = vld [vmem:[%s452_s1 + $0x38] sm:$0xff]   ;;  %v318_v17 = vld [vmem:[%s451_s0] sm:$0xff]   ;;  %22 = vst.msk [vmem:[#allocation2 + $0x8] sm:$0xff] %vm20_vm2, %v357_v25 }
   0x8   :  { %v121_v16 = vsel %vm95_vm0, %v317_v15, 0  ;;  %v261_v18 = vld [vmem:[%s453_s2] ss:$0 sm:$0xff]  ;;  %23 = vst.msk [vmem:[#allocation3] sm:$0xff] %vm20_vm2, %v355_v1  ;;  %24 = vst.msk [vmem:[#allocation3 + $0x8] sm:$0xff] %vm20_vm2, %v355_v1  ;;  %v358_v26 = vmov 0  }
   0x9   :  { %308 = vset.pattern.permute.xlu1 %v358_v26  ;;  %309 = vset.pattern.permute.xlu0 %v358_v26  ;;  %s359_s0 = smov [#allocation4]  }
   0xa   :  { %s249_s1 = sshll.u32 %s359_s0, 4  ;;  %s250_s1 = int_to_ptr.vmem [resolvable:$true] %s249_s1 }
   0xb   :  { %284 = vmatpush3.bf16.xpose.msra.mxu0 %v103_v4  ;;  %s331_s2 = scalar_lea.vmem %s250_s1, 256  ;;  %p336_p1 = scmp.lt.s32.totalorder %s250_s1, %s250_s1 }
   0xc   :  { %285 = vmatprep.subr.bf16.mxu0 %v355_v1  ;;  %p332_p0 = scmp.ne.s32.totalorder %s250_s1, %s331_s2  ;;  %p337_p2 = scmp.lt.s32.totalorder %s331_s2, %s331_s2 }
   0xd   :  { %v164_v27 = vld [vmem:[#allocation2] sm:$0xff] }
   0xe   :  { %v165_v30 = vld [vmem:[#allocation2 + $0x8] sm:$0xff]  ;;  %p338_p3 = por %p337_p2, %p336_p1 }
   0xf   :  { %v172_v46 = vld [vmem:[#allocation3] sm:$0xff]  ;;  %v173_v50 = vld [vmem:[#allocation3 + $0x8] sm:$0xff] }
  0x10   :  { %p339_p4 = pnand %p338_p3, %p332_p0 }
  0x13   :  { %286 = vmatpush3.bf16.xpose.msra.mxu0 %v106_v6 }
  0x14   :  { %287 = vmatprep.subr.bf16.mxu0 %v355_v1 }
  0x1b   :  { %288 = vmatpush3.bf16.xpose.msra.mxu0 %v109_v8 }
  0x1c   :  { %289 = vmatprep.subr.bf16.mxu0 %v355_v1 }
  0x23   :  { %290 = vmatpush3.bf16.xpose.msra.mxu0 %v112_v10 }
  0x24   :  { %291 = vmatprep.subr.bf16.mxu0 %v355_v1 }
  0x2b   :  { %292 = vmatpush3.bf16.xpose.msra.mxu0 %v115_v12 }
  0x2c   :  { %293 = vmatprep.subr.bf16.mxu0 %v355_v1 }
  0x33   :  { %294 = vmatpush3.bf16.xpose.msra.mxu0 %v118_v14 }
  0x34   :  { %295 = vmatprep.subr.bf16.mxu0 %v355_v1 }
  0x3b   :  { %296 = vmatpush3.bf16.xpose.msra.mxu0 %v121_v16 }
  0x42   :  { %298 = vmatmul.mubr.msk.bf16.vlgmr.msra.gmra.mrb[0].mxu0 %vm95_vm0, %v318_v17 }
 0x115   :  { %v157_v19 = vpop.f32.mrb[0].mxu0 }
 0x116   :  { %v421_v20 = vadd.f32 %v261_v18, %v157_v19  ;;  %v299_v21 = vpop.f32.mrb[1].mxu0 }
 0x117   :  { %v160_v22 = vpop.f32.mrb[2].mxu0 }
 0x118   :  { %166 = vmax.xlane.f32.xlu0 %v421_v20  ;;  %v300_v23 = vpop.f32.mrb[3].mxu0  ;;  %v424_v24 = vadd.f32 %v261_v18, %v160_v22 }
 0x11c   :  { %168 = vmax.xlane.f32.xlu0 %v424_v24 }
 0x1a5   :  { %v167_v28 = vpop.xlane.xlu0 %166 }
 0x1a6   :  { %v170_v29 = vmax.f32 %v164_v27, %v167_v28 }
 0x1a8   :  { %v174_v31 = vsub.f32 %v164_v27, %v170_v29  ;;  %207 = vst.msk [vmem:[#allocation2] sm:$0xff] %vm20_vm2, %v170_v29  ;;  %184 = vperm.xlu1 %308, %v170_v29  }
 0x1a9   :  { %v169_v32 = vpop.xlane.xlu0 %168 }
 0x1aa   :  { %v171_v33 = vmax.f32 %v165_v30, %v169_v32  ;;  %v176_v43 = vmul.f32 1.442695, %v174_v31 }
 0x1ac   :  { %v175_v34 = vsub.f32 %v165_v30, %v171_v33  ;;  %208 = vst.msk [vmem:[#allocation2 + $0x8] sm:$0xff] %vm20_vm2, %v171_v33  ;;  %189 = vperm.xlu1 %308, %v171_v33  }
 0x1ae   :  { %v178_v44 = vmul.f32 1.442695, %v175_v34 }
 0x1af   :  { %v218_v59 = vld [vmem:[#allocation2] sm:$0xff] }
 0x1b3   :  { %v219_v63 = vld [vmem:[#allocation2 + $0x8] sm:$0xff] }
 0x227   :  { %v185_v35 = vpop.permute.xlu1 %184 }
 0x228   :  { %v192_v36 = vsub.f32 %v421_v20, %v185_v35 }
 0x22a   :  { %v194_v37 = vmul.f32 1.442695, %v192_v36 }
 0x22b   :  { %v190_v38 = vpop.permute.xlu1 %189 }
 0x22c   :  { %319 = vpow2.f32 %v194_v37  ;;  %v193_v39 = vsub.f32 %v424_v24, %v190_v38 }
 0x22e   :  { %v196_v40 = vmul.f32 1.442695, %v193_v39 }
 0x230   :  { %321 = vpow2.f32 %v196_v40 }
 0x231   :  { %323 = vpow2.f32 %v176_v43 }
 0x232   :  { %325 = vpow2.f32 %v178_v44 }
 0x236   :  { %v320_v41 = vpop.eup %319 }
 0x237   :  { %198 = vadd.xlane.f32.xlu0 %v320_v41 }
 0x23a   :  { %v322_v42 = vpop.eup %321 }
 0x23b   :  { %200 = vadd.xlane.f32.xlu1 %v322_v42  ;;  %v324_v45 = vpop.eup %323 }
 0x23c   :  { %v180_v47 = vmul.f32 %v324_v45, %v172_v46  ;;  %v326_v48 = vpop.eup %325 }
 0x23d   :  { %v181_v52 = vmul.f32 %v326_v48, %v173_v50 }
 0x2c4   :  { %v199_v49 = vpop.xlane.xlu0 %198 }
 0x2c5   :  { %v202_v51 = vadd.f32 %v199_v49, %v180_v47 }
 0x2c7   :  { %205 = vst.msk [vmem:[#allocation3] sm:$0xff] %vm20_vm2, %v202_v51 }
 0x2c8   :  { %v201_v53 = vpop.xlane.xlu1 %200 }
 0x2c9   :  { %v203_v54 = vadd.f32 %v201_v53, %v181_v52 }
 0x2cb   :  { %206 = vst.msk [vmem:[#allocation3 + $0x8] sm:$0xff] %vm20_vm2, %v203_v54 }
 0x2ce   :  { %v220_v55 = vld [vmem:[#allocation3] sm:$0xff] }
 0x2cf   :  { %327 = vlog2.f32 %v220_v55 }
 0x2d2   :  { %v221_v56 = vld [vmem:[#allocation3 + $0x8] sm:$0xff] }
 0x2d3   :  { %329 = vlog2.f32 %v221_v56 }
 0x2d9   :  { %v328_v57 = vpop.eup %327 }
 0x2da   :  { %v223_v58 = vmul.f32 0.6931472, %v328_v57 }
 0x2dc   :  { %v226_v60 = vadd.f32 %v223_v58, %v218_v59 }
 0x2dd   :  { %v330_v61 = vpop.eup %329 }
 0x2de   :  { %232 = vperm.xlu0 %309, %v226_v60   ;;  %v225_v62 = vmul.f32 0.6931472, %v330_v61 }
 0x2e0   :  { %v227_v0 = vadd.f32 %v225_v62, %v219_v63 }
 0x2e2   :  { %237 = vperm.xlu1 %308, %v227_v0  }
 0x35d   :  { %v233_v1 = vpop.permute.xlu0 %232 }
 0x35e   :  { %v240_v2 = vsub.f32 %v421_v20, %v233_v1 }
 0x360   :  { %242 = vst [vmem:[#allocation4] sm:$0xff] %v240_v2 }
 0x361   :  { %v238_v3 = vpop.permute.xlu1 %237 }
 0x362   :  { %v241_v4 = vsub.f32 %v424_v24, %v238_v3 }
 0x364   :  { %243 = vst [vmem:[#allocation4 + $0x8] sm:$0xff] %v241_v4 }
 0x365   :  { %342 = shalt.err (!%p339_p4)
}
 0x366   :  { %s343_s7 = scalar_lea.hbm %s454_s3, 256 }
 0x367   :  { %p344_p5 = scmp.ne.s32.totalorder %s454_s3, %s343_s7  ;;  %p347_p6 = scmp.lt.u32.totalorder %s343_s7, %s454_s3 }
 0x369   :  { %p349_p7 = pnand %p347_p6, %p344_p5 }
 0x36b   :  { %352 = shalt.err (!%p349_p7)
}
 0x36c   :  { %s360_s12 = smov 128   ;;  %s361_s13 = smov 8  }
 0x36d   :  { %255 = dma.vmem_to_hbm [thread:$0]  %s250_s1, 256, %s454_s3, [#allocation5], %s360_s12, %s360_s12, %s361_s13  }
 0x36e   :  { %353 = dma.done.wait [#allocation5], 256  }
 0x36f   :  { %354 = vsyncadd [#allocation5], 4294967040 }
 0x370   :  { %259 = vsyncpa [#allocation5], 1 }

</bundles_post_ra>
